<compile_context>
chip_gen: v5e
topology: v5e:2x2
jax: 0.10.0
libtpu: 0.0.40
codegen_flags: <defaults>
</compile_context>

<pallas_src>
import numpy as np
import jax
import jax.numpy as jnp
from jax.experimental import pallas as pl
from jax.experimental.pallas import tpu as pltpu


# ---------------------------------------------------------------------------
# Host-side glue: exact torchvision sampling math, factorized per axis.
# ---------------------------------------------------------------------------
def _axis_weights(start, bin_sz, grid_n, n_out, size):
    """Per-axis RoIAlign sampling weights (exact torchvision math).

    Returns W[N, n_out, size]: W[n, p, j] = (1/max(grid_n[n],1)) *
      sum_{i < grid_n[n]} linear-interp weight of sample
      (start + p*bin + (i+0.5)*bin/grid) onto integer position j.
    """
    N = start.shape[0]
    G = int(max(int(grid_n.max()), 1))
    p = np.arange(n_out)[None, :, None]                      # [1, n_out, 1]
    i = np.arange(G)[None, None, :]                          # [1, 1, G]
    g = grid_n[:, None, None].astype(np.float64)             # [N, 1, 1]
    gc = np.maximum(g, 1.0)
    c = (start[:, None, None] + p * bin_sz[:, None, None]
         + (i + 0.5) * bin_sz[:, None, None] / gc)           # [N, n_out, G]
    valid = i < grid_n[:, None, None]       # mask samples beyond adaptive grid
    oob = (c < -1.0) | (c > size)           # out-of-bounds sample contributes 0
    cc = np.clip(c, 0.0, None)
    lo = np.floor(cc).astype(np.int64)
    hi = lo + 1
    at_edge = lo >= size - 1
    lo = np.where(at_edge, size - 1, lo)
    hi = np.where(at_edge, size - 1, hi)
    cc = np.where(at_edge, lo.astype(np.float64), cc)
    l = cc - lo
    h = 1.0 - l
    keep = (valid & ~oob).astype(np.float64) / gc
    w_lo = h * keep
    w_hi = l * keep

    W = np.zeros((N, n_out, size), np.float64)
    nb = np.broadcast_to(np.arange(N)[:, None, None], lo.shape)
    pb = np.broadcast_to(np.arange(n_out)[None, :, None], lo.shape)
    np.add.at(W, (nb, pb, lo), w_lo)
    np.add.at(W, (nb, pb, hi), w_hi)
    return W


def _build_separable_roi_weights(boxes, H, W, out_h, out_w, scale, aligned,
                                 sampling_ratio=-1):
    """Exact torchvision roi_align sampling, factorized per axis.

    Returns (Wy[N, out_h, H], Wx[N, out_w, W]) float32 such that the dense
    interpolation matrix of ROI n is the outer product Wy[n] (x) Wx[n]."""
    boxes = np.asarray(boxes, dtype=np.float64)
    N = boxes.shape[0]
    offset = 0.5 if aligned else 0.0
    start_w = boxes[:, 1] * scale - offset
    start_h = boxes[:, 2] * scale - offset
    end_w = boxes[:, 3] * scale - offset
    end_h = boxes[:, 4] * scale - offset
    roi_w = end_w - start_w
    roi_h = end_h - start_h
    if not aligned:                       # legacy (torch 1.3): roi size >= 1
        roi_w = np.maximum(roi_w, 1.0)
        roi_h = np.maximum(roi_h, 1.0)
    bin_h = roi_h / out_h
    bin_w = roi_w / out_w
    if sampling_ratio > 0:
        grid_h = np.full((N,), sampling_ratio, np.int64)
        grid_w = np.full((N,), sampling_ratio, np.int64)
    else:                                 # adaptive sampling grid
        grid_h = np.ceil(roi_h / out_h).astype(np.int64)
        grid_w = np.ceil(roi_w / out_w).astype(np.int64)
    Wy = _axis_weights(start_h, bin_h, grid_h, out_h, H)
    Wx = _axis_weights(start_w, bin_w, grid_w, out_w, W)
    return Wy.astype(np.float32), Wx.astype(np.float32)


# ---------------------------------------------------------------------------
# Pallas kernel: per ROI, two channel-batched matmuls on the MXU.
# ---------------------------------------------------------------------------
def _roi_align_kernel(bidx_ref, wxt_ref, wy_ref, x_ref, o_ref):
    # wxt_ref: [W, out_w]       x-axis weights of this ROI (pre-transposed)
    # wy_ref : [out_h, H]       y-axis weights of this ROI
    # x_ref  : [C, H, W]        feature map of this ROI's image
    # o_ref  : [C, out_h, out_w]
    del bidx_ref  # only consumed by the BlockSpec index_maps
    C = x_ref.shape[0]
    x = x_ref[...]
    wxt = jnp.broadcast_to(wxt_ref[...], (C,) + wxt_ref.shape)   # [C, W, out_w]
    wy = jnp.broadcast_to(wy_ref[...], (C,) + wy_ref.shape)      # [C, out_h, H]
    # contract W, then H (batched over channels), accumulate in f32 on the MXU.
    t = jnp.einsum('chw,cwq->chq', x, wxt, preferred_element_type=jnp.float32)
    o = jnp.einsum('cph,chq->cpq', wy, t, preferred_element_type=jnp.float32)
    o_ref[...] = o.astype(o_ref.dtype)


def roi_align(feat_nchw, bboxes, out_size=(28, 28), scale=1.0, aligned=False,
              sampling_ratio=-1):
    """feat_nchw: [B, C, H, W]; bboxes: [N, 5] = [b_idx, x0, y0, x1, y1].
    Returns [N, C, out_h, out_w] float32 (torch-1.3 roi_align semantics)."""
    feat = jnp.asarray(feat_nchw, jnp.float32)
    B, C, H, W = feat.shape
    out_h, out_w = out_size

    boxes_np = np.asarray(bboxes, dtype=np.float64)
    N = int(boxes_np.shape[0])
    if N == 0:
        return jnp.zeros((0, C, out_h, out_w), jnp.float32)

    # Sort ROIs by batch index so consecutive grid steps reuse the same
    # feature block (Pallas skips the DMA when the block index is unchanged).
    bidx_np = boxes_np[:, 0].astype(np.int32)
    order = np.argsort(bidx_np, kind="stable")
    inv_order = np.argsort(order).astype(np.int32)
    boxes_sorted = boxes_np[order]

    wy_np, wx_np = _build_separable_roi_weights(
        boxes_sorted, H, W, out_h, out_w, scale, aligned, sampling_ratio)
    wy = jnp.asarray(wy_np)                                        # [N, out_h, H]
    wxt = jnp.asarray(np.ascontiguousarray(wx_np.transpose(0, 2, 1)))  # [N, W, out_w]
    bidx = jnp.asarray(bidx_np[order])

    out_sorted = pl.pallas_call(
        _roi_align_kernel,
        out_shape=jax.ShapeDtypeStruct((N, C, out_h, out_w), jnp.float32),
        grid_spec=pltpu.PrefetchScalarGridSpec(
            num_scalar_prefetch=1,           # bidx -> SMEM, drives feature DMA
            grid=(N,),
            in_specs=[
                pl.BlockSpec((None, W, out_w), lambda n, b: (n, 0, 0)),
                pl.BlockSpec((None, out_h, H), lambda n, b: (n, 0, 0)),
                pl.BlockSpec((None, C, H, W), lambda n, b: (b[n], 0, 0, 0)),
            ],
            out_specs=pl.BlockSpec((None, C, out_h, out_w),
                                   lambda n, b: (n, 0, 0, 0)),
        ),
        compiler_params=pltpu.CompilerParams(
            dimension_semantics=("parallel",)),   # ROIs independent -> 2 TCs on v7x
    )(bidx, wxt, wy, feat)

    if np.array_equal(order, np.arange(N)):
        return out_sorted
    return out_sorted[jnp.asarray(inv_order)]


class RoIAlign:
    """JAX/Pallas equivalent of the PyTorch RoIAlign module (no learnable params)."""

    def __init__(self, out_size=(28, 28), scale=1.0, aligned=True):
        self.out_size = out_size
        self.scale = scale
        # NOTE: torch 1.3's roi_align has no `aligned` kwarg, so the reference
        # module effectively runs with aligned=False; the constructor arg is
        # kept for API parity but forward uses aligned=False.
        self.aligned = aligned

    def __call__(self, input, bboxes):
        return roi_align(input, bboxes, out_size=self.out_size,
                         scale=self.scale, aligned=False)


if __name__ == "__main__":
    key = jax.random.PRNGKey(0)
    k1, k2, k3 = jax.random.split(key, 3)

    B, C, H, W = 2, 4, 16, 16
    x = jax.random.normal(k1, (B, C, H, W), dtype=jnp.float32)

    # bboxes: [b_idx, x0, y0, x1, y1] in feature coordinates (scale = 1.0)
    N = 3
    xy0 = jax.random.uniform(k2, (N, 2), minval=0.0, maxval=9.0)
    wh = jax.random.uniform(k3, (N, 2), minval=2.0, maxval=6.0)
    b_idx = jnp.array([[0.0], [1.0], [0.0]], dtype=jnp.float32)
    bboxes = jnp.concatenate([b_idx, xy0, xy0 + wh], axis=1)

    module = RoIAlign(out_size=(28, 28), scale=1.0, aligned=True)
    out = module(x, bboxes)
    out = jax.block_until_ready(out)
    assert out.shape == (N, C, 28, 28) and out.dtype == jnp.float32

    # Reference: dense reconstruction from the same separable weights
    # (validates the Pallas kernel's matmul path and the ROI sort/unsort).
    boxes_np = np.asarray(bboxes, np.float64)
    wy_ref, wx_ref = _build_separable_roi_weights(boxes_np, H, W, 28, 28, 1.0, False)
    feat_np = np.asarray(x, np.float64)
    ref = np.einsum('nph,nqw,nchw->ncpq', wy_ref, wx_ref,
                    feat_np[boxes_np[:, 0].astype(np.int64)])
    np.testing.assert_allclose(np.asarray(out), ref, rtol=2e-2, atol=2e-2)
    print("KERNEL_OK")
</pallas_src>

<mosaic_0001>
module attributes {stable_mosaic.version = 11 : i64} {
  func.func @_roi_align_kernel(%arg0: i32, %arg1: memref<3xi32, #tpu.memory_space<smem>>, %arg2: memref<1x16x28xf32, #tpu.memory_space<vmem>>, %arg3: memref<1x28x16xf32, #tpu.memory_space<vmem>>, %arg4: memref<1x4x16x16xf32, #tpu.memory_space<vmem>>, %arg5: memref<1x4x28x28xf32, #tpu.memory_space<vmem>>) attributes {dimension_semantics = [#tpu.dimension_semantics<parallel>], iteration_bounds = array<i64: 3>, scalar_prefetch = 1 : i64, scratch_operands = 0 : i64, tpu.core_type = #tpu.core_type<tc>, window_params = [{transform_indices = @transform_0, window_bounds = array<i64: 1, 16, 28>}, {transform_indices = @transform_1, window_bounds = array<i64: 1, 28, 16>}, {transform_indices = @transform_2, window_bounds = array<i64: 1, 4, 16, 16>}, {transform_indices = @transform_3, window_bounds = array<i64: 1, 4, 28, 28>}]} {
    %c0 = arith.constant 0 : index
    %c0_0 = arith.constant 0 : index
    %c0_1 = arith.constant 0 : index
    %c0_2 = arith.constant 0 : index
    %0 = vector.load %arg4[%c0, %c0_0, %c0_1, %c0_2] : memref<1x4x16x16xf32, #tpu.memory_space<vmem>>, vector<1x4x16x16xf32>
    %1 = vector.shape_cast %0 : vector<1x4x16x16xf32> to vector<4x16x16xf32>
    %c0_3 = arith.constant 0 : index
    %c0_4 = arith.constant 0 : index
    %c0_5 = arith.constant 0 : index
    %2 = vector.load %arg2[%c0_3, %c0_4, %c0_5] : memref<1x16x28xf32, #tpu.memory_space<vmem>>, vector<1x16x28xf32>
    %3 = vector.shape_cast %2 : vector<1x16x28xf32> to vector<16x28xf32>
    %4 = vector.shape_cast %3 : vector<16x28xf32> to vector<1x16x28xf32>
    %5 = vector.broadcast %4 : vector<1x16x28xf32> to vector<4x16x28xf32>
    %c0_6 = arith.constant 0 : index
    %c0_7 = arith.constant 0 : index
    %c0_8 = arith.constant 0 : index
    %6 = vector.load %arg3[%c0_6, %c0_7, %c0_8] : memref<1x28x16xf32, #tpu.memory_space<vmem>>, vector<1x28x16xf32>
    %7 = vector.shape_cast %6 : vector<1x28x16xf32> to vector<28x16xf32>
    %8 = vector.shape_cast %7 : vector<28x16xf32> to vector<1x28x16xf32>
    %9 = vector.broadcast %8 : vector<1x28x16xf32> to vector<4x28x16xf32>
    "tpu.trace_start"() <{level = 10 : i32, message = "chw,cwq->chq"}> : () -> ()
    %cst = arith.constant dense<0.000000e+00> : vector<4x16x28xf32>
    %10 = tpu.matmul %1, %5, %cst {dimension_numbers = #tpu.dot_dimension_numbers<[2], [1], [1], [2], [0, 0, 0, 1, 1, 2], [0], [0]>} : vector<4x16x16xf32>, vector<4x16x28xf32>, vector<4x16x28xf32> -> vector<4x16x28xf32>
    "tpu.trace_stop"() : () -> ()
    "tpu.trace_start"() <{level = 10 : i32, message = "cph,chq->cpq"}> : () -> ()
    %cst_9 = arith.constant dense<0.000000e+00> : vector<4x28x28xf32>
    %11 = tpu.matmul %9, %10, %cst_9 {dimension_numbers = #tpu.dot_dimension_numbers<[2], [1], [1], [2], [0, 0, 0, 1, 1, 2], [0], [0]>} : vector<4x28x16xf32>, vector<4x16x28xf32>, vector<4x28x28xf32> -> vector<4x28x28xf32>
    "tpu.trace_stop"() : () -> ()
    %c0_10 = arith.constant 0 : index
    %c0_11 = arith.constant 0 : index
    %c0_12 = arith.constant 0 : index
    %c0_13 = arith.constant 0 : index
    %12 = vector.load %arg5[%c0_10, %c0_11, %c0_12, %c0_13] : memref<1x4x28x28xf32, #tpu.memory_space<vmem>>, vector<1x4x28x28xf32>
    %13 = vector.shape_cast %12 : vector<1x4x28x28xf32> to vector<4x28x28xf32>
    %14 = vector.shape_cast %11 : vector<4x28x28xf32> to vector<1x4x28x28xf32>
    tpu.vector_store %arg5[%c0_10, %c0_11, %c0_12, %c0_13], %14 {strides = array<i32>} : memref<1x4x28x28xf32, #tpu.memory_space<vmem>>, vector<1x4x28x28xf32>,
    return
  }
  func.func @transform_0(%arg0: i32, %arg1: memref<3xi32, #tpu.memory_space<smem>>) -> (i32, i32, i32) {
    %c0_i32 = arith.constant 0 : i32
    %c0_i32_0 = arith.constant 0 : i32
    %c0_i32_1 = arith.constant 0 : i32
    return %arg0, %c0_i32, %c0_i32_0 : i32, i32, i32
  }
  func.func @transform_1(%arg0: i32, %arg1: memref<3xi32, #tpu.memory_space<smem>>) -> (i32, i32, i32) {
    %c0_i32 = arith.constant 0 : i32
    %c0_i32_0 = arith.constant 0 : i32
    %c0_i32_1 = arith.constant 0 : i32
    return %arg0, %c0_i32, %c0_i32_0 : i32, i32, i32
  }
  func.func @transform_2(%arg0: i32, %arg1: memref<3xi32, #tpu.memory_space<smem>>) -> (i32, i32, i32, i32) {
    %0 = arith.index_cast %arg0 : i32 to index
    %1 = memref.load %arg1[%0] : memref<3xi32, #tpu.memory_space<smem>>
    %c0_i32 = arith.constant 0 : i32
    %c0_i32_0 = arith.constant 0 : i32
    %c0_i32_1 = arith.constant 0 : i32
    %c0_i32_2 = arith.constant 0 : i32
    return %1, %c0_i32, %c0_i32_0, %c0_i32_1 : i32, i32, i32, i32
  }
  func.func @transform_3(%arg0: i32, %arg1: memref<3xi32, #tpu.memory_space<smem>>) -> (i32, i32, i32, i32) {
    %c0_i32 = arith.constant 0 : i32
    %c0_i32_0 = arith.constant 0 : i32
    %c0_i32_1 = arith.constant 0 : i32
    %c0_i32_2 = arith.constant 0 : i32
    return %arg0, %c0_i32, %c0_i32_0, %c0_i32_1 : i32, i32, i32, i32
  }
}

</mosaic_0001>

<bundles_post_ra>
// kernel: tpu_custom_call.1
= control target key start
LH: loop header
LB: loop body
LE: loop exit
PB: predicated region body
PF: predicated region fallthrough
CT: control target
= control target key end

     0   :  { %s783_s18 = smov [#allocation3]   ;;  %s971_s0 = inlined_call_operand.vmem [shape: s32[3], index: 0, kind: input, shape index: {}]   ;;  %s972_s1 = inlined_call_operand.hbm [shape: f32[3,16,28], index: 1, kind: input, shape index: {}]   ;;  %s973_s2 = inlined_call_operand.vmem [shape: f32[3,28,16], index: 2, kind: input, shape index: {}]   ;;  %s974_s3 = inlined_call_operand.vmem [shape: f32[2,4,16,16], index: 3, kind: input, shape index: {}]   ;;  %s975_s4 = inlined_call_operand.vmem [shape: f32[3,4,28,28], index: 4, kind: output, shape index: {}]  }
   0x1   :  { %s10_s17 = sshll.u32 %s971_s0, 4  ;;  %s11_s17 = int_to_ptr.vmem [resolvable:$true] %s10_s17 }
   0x2   :  { %13 = dma.vmem_to_smem %s11_s17, 16, %s783_s18, [#allocation2] }
   0x3   :  { %761 = dma.done.wait [#allocation2], 16 }
   0x4   :  { %762 = vsyncadd [#allocation2], 4294967280 }
   0x5   :  { %16 = sfence }
   0x6   :  { %17 = vsyncpa [#allocation5], 0 }
   0x7   :  { %19 = vsyncpa [#allocation5 + $0x1], 0  ;;  %s814_s19 = smov 0   ;;  %s816_s20 = smov 0  }
   0x8   :  { %s818_s21 = smov 0   ;;  %s820_s22 = smov 0  }
   0x9 LB: > { %s833_s0 = sadd.s32 4294967295, %s781_s22   ;;  %s836_s23 = sadd.s32 1, %s781_s22   ;;  %s781_s22 = sphi %s820_s22, %s982_s22   ;;  %s777_s21 = sphi %s818_s21, %s981_s21   ;;  %s773_s20 = sphi %s816_s20, %s980_s20   ;;  %s769_s19 = sphi %s814_s19, %s979_s19  }
   0xa   : > { %s29_s24 = ssub.s32 %s781_s22, %s836_s23  ;;  %s32_s25 = sadd.s32 1, %s777_s21 }
   0xb   : > { %p30_p0 = scmp.eq.s32.totalorder %s29_s24, 0  ;;  %p39_p1 = scmp.ne.s32.totalorder %s777_s21, %s773_s20 }
   0xc   : > { %p40_p2 = scmp.eq.s32.totalorder %s781_s22, 0  ;;  %p45_p3 = scmp.ne.s32.totalorder %s773_s20, %s769_s19 }
   0xd   : > { %s846_s26 = scalar_select %p30_p0, %s777_s21, %s32_s25  }
   0xe   : > { %p848_p4 = por %p40_p2, %p39_p1  ;;  %p46_p5 = scmp.eq.s32.totalorder %s833_s0, 0 }
   0xf   : > { %p667_p6 = scmp.lt.s32.totalorder %s781_s22, 3  ;;  %s149_s29 = sand.u32 1, %s777_s21  }
  0x10   : > { %p854_p7 = por %p46_p5, %p45_p3  ;;  %s620_s30 = sshll.u32 %s149_s29, 4 }
  0x11   : > { %s657_s5 = sshll.u32 %s781_s22, 4  ;;  %s153_s9 = scalar_lea.vmem [#allocation4], %s620_s30 }
  0x12   : > { %s158_s8 = scalar_lea.hbm %s972_s1, %s657_s5  ;;  %s161_s10 = sshll.u32 %s153_s9, 4  ;;  %s162_s10 = int_to_ptr.vmem [resolvable:$true] %s161_s10 }
  0x13   : > { %s159_s11 = sshll.u32 %s158_s8, 4  ;;  %p865_p8 = pnand %p667_p6, %p848_p4  ;;  %s160_s11 = int_to_ptr.hbm [resolvable:$true] %s159_s11 }
  0x14   : > { %p623_p9 = scmp.ge.s32.totalorder %s781_s22, 1  ;;  %s150_s13 = scalar_lea.sflag [#allocation5], %s149_s29 }
  0x15   : > { %s715_s14 = sshra.s32 %s160_s11, 4  ;;  %p719_p11 = pneg %p865_p8  ;;  %s716_s14 = int_to_ptr.hbm [resolvable:$true] %s715_s14 }
  0x16   : > { %s717_s15 = scalar_lea.hbm %s716_s14, 16  ;;  %s722_s18 = scalar_lea.hbm %s972_s1, 48 }
  0x17   : > { %p718_p10 = scmp.ne.s32.totalorder %s716_s14, %s717_s15  ;;  %p723_p0 = scmp.lt.s32.totalorder %s716_s14, %s972_s1 }
  0x18   : > { %p724_p1 = scmp.lt.s32.totalorder %s722_s18, %s717_s15 }
  0x19   : > { %p720_p12 = pnand %p719_p11, %p718_p10 }
  0x1a   : > { %p725_p2 = por %p724_p1, %p723_p0 }
  0x1b   : > { %p721_p13 = pneg %p720_p12 }
  0x1d   : > { %p726_p3 = pnand %p725_p2, %p721_p13 }
  0x1f   : > { %729 = shalt.err (!%p726_p3)
}
  0x20   : > { %s784_s25 = smov 128   ;;  %s785_s27 = smov 8  }
  0x21   : > { %666 = dma.hbm_to_vmem [thread:$0]  (!%p865_p8), %s160_s11, 256, %s162_s10, %s150_s13, %s784_s25, %s784_s25, %s785_s27  }
  0x22   : > { %p187_p4 = scmp.lt.s32.totalorder %s781_s22, 4 }
  0x24   : > { %p188_p5 = pnand %p623_p9, %p187_p4 }
  0x25   : > { %s193_s29 = sand.u32 (!%p188_p5), 1, %s773_s20  }
  0x26   : > { %191 = sbr.rel (%p188_p5) target bundleno = 357 (0x165), region = 32  ;;  %s624_s30 = sshll.u32 (!%p188_p5), %s193_s29, 4 }
  0x27   : > { %s194_s5 = scalar_lea.sflag (!%p188_p5), [#allocation5], %s193_s29  ;;  %s197_s6 = scalar_lea.vmem (!%p188_p5), [#allocation4], %s624_s30 }
  0x2b   : > { %764 = dma.done.wait (%p854_p7), %s194_s5, 256  }
  0x2c   : > { %766 = vsyncadd (%p854_p7), %s194_s5, 4294967040  ;;  %s237_s7 = sld [smem:[#allocation3 + %s833_s0]]  ;;  %v258_v0 = vld [vmem:[%s197_s6 + $0x8] sm:$0xff]  ;;  %v257_v1 = vld [vmem:[%s197_s6] sm:$0xff]  ;;  %vm263_vm0 = vcmask 130048   ;;  %p232_p7 = scmp.lt.s32.totalorder %s833_s0, 2 }
  0x2d   : > { %342 = vmatpush.msra.mxu2 %v258_v0  ;;  %371 = vmatpush.msra.mxu3 %v258_v0  ;;  %vm508_vm1 = vcmask 228352   ;;  %vm512_vm2 = vcmask 224256  }
  0x2e   : > { %284 = vmatpush.msra.mxu0 %v258_v0  ;;  %313 = vmatpush.msra.mxu1 %v258_v0  ;;  %s986_s0 = smov (!%p232_p7, %s833_s0), 2 }
  0x2f   : > { %343 = vmatpush.msra.mxu2 %v257_v1  ;;  %372 = vmatpush.msra.mxu3 %v257_v1  ;;  %s658_s10 = sshll.u32 %s986_s0, 5  ;;  %s660_s14 = sshll.u32 %s986_s0, 7 }
  0x30   : > { %285 = vmatpush.msra.mxu0 %v257_v1  ;;  %314 = vmatpush.msra.mxu1 %v257_v1  ;;  %s236_s13 = scalar_lea.vmem %s973_s2, %s658_s10  ;;  %s928_s17 = scalar_lea.vmem %s975_s4, %s660_s14 }
  0x31   : > { %v259_v16 = vld [vmem:[%s236_s13] sm:$0xff]  ;;  %v260_v19 = vld [vmem:[%s236_s13 + $0x8] sm:$0xff]  ;;  %v261_v20 = vld [vmem:[%s236_s13 + $0x10] sm:$0xff] }
  0x32   : > { %p238_p6 = scmp.lt.s32.totalorder %s237_s7, 1  ;;  %v262_v21 = vld [vmem:[%s236_s13 + $0x18] sm:$0xf] }
  0x34   : > { %s984_s7 = smov (!%p238_p6, %s237_s7), 1 }
  0x35   : > { %s659_s22 = sshll.u32 %s984_s7, 6 }
  0x36   : > { %s242_s28 = scalar_lea.vmem %s974_s3, %s659_s22 }
  0x37   : > { %v253_v2 = vld [vmem:[%s242_s28 + $0x20] sm:$0xff]  ;;  %v255_v3 = vld [vmem:[%s242_s28 + $0x30] sm:$0xff]  ;;  %v254_v6 = vld [vmem:[%s242_s28 + $0x28] sm:$0xff] }
  0x38   : > { %v249_v4 = vld [vmem:[%s242_s28] sm:$0xff]  ;;  %635 = vmatmul.msk.f32.vlgmr.msra.gmra.mxu2 %vm263_vm0, %v253_v2  ;;  %637 = vmatmul.msk.f32.vlgmr.msra.gmra.mxu3 %vm263_vm0, %v255_v3  ;;  %v251_v5 = vld [vmem:[%s242_s28 + $0x10] sm:$0xff]  ;;  %v256_v7 = vld [vmem:[%s242_s28 + $0x38] sm:$0xff] }
  0x39   : > { %631 = vmatmul.msk.f32.vlgmr.msra.gmra.mxu0 %vm263_vm0, %v249_v4  ;;  %633 = vmatmul.msk.f32.vlgmr.msra.gmra.mxu1 %vm263_vm0, %v251_v5  ;;  %v250_v8 = vld [vmem:[%s242_s28 + $0x8] sm:$0xff]  ;;  %v252_v9 = vld [vmem:[%s242_s28 + $0x18] sm:$0xff] }
  0x40   : > { %636 = vmatmul.msk.f32.gmra.mxu2 %vm263_vm0, %v254_v6  ;;  %638 = vmatmul.msk.f32.gmra.mxu3 %vm263_vm0, %v256_v7 }
  0x41   : > { %632 = vmatmul.msk.f32.gmra.mxu0 %vm263_vm0, %v250_v8  ;;  %634 = vmatmul.msk.f32.gmra.mxu1 %vm263_vm0, %v252_v9 }
  0xb6   : > { %v287_v10 = vpop.f32.mrf.mxu0  ;;  %v316_v11 = vpop.f32.mrf.mxu1 }
  0xbb   : > { %v345_v12 = vpop.f32.mrf.mxu2  ;;  %v374_v13 = vpop.f32.mrf.mxu3 }
  0xbe   : > { %v290_v14 = vpop.f32.mrf.mxu0  ;;  %v319_v15 = vpop.f32.mrf.mxu1 }
  0xbf   : > { %406 = vmatpush.msrb.mxu0 %v290_v14  ;;  %435 = vmatpush.msrb.mxu1 %v319_v15 }
  0xc1   : > { %407 = vmatpush.msrb.mxu0 %v287_v10  ;;  %436 = vmatpush.msrb.mxu1 %v316_v11 }
  0xc2   : > { %639 = vmatmul.msk.f32.vlgmr.msrb.gmra.mxu0 %vm263_vm0, %v259_v16  ;;  %643 = vmatmul.msk.f32.vlgmr.msrb.gmra.mxu1 %vm263_vm0, %v259_v16 }
  0xc3   : > { %v348_v17 = vpop.f32.mrf.mxu2  ;;  %v377_v18 = vpop.f32.mrf.mxu3 }
  0xc4   : > { %464 = vmatpush.msrb.mxu2 %v348_v17  ;;  %493 = vmatpush.msrb.mxu3 %v377_v18 }
  0xc6   : > { %465 = vmatpush.msrb.mxu2 %v345_v12  ;;  %494 = vmatpush.msrb.mxu3 %v374_v13 }
  0xc7   : > { %647 = vmatmul.msk.f32.vlgmr.msrb.gmra.mxu2 %vm263_vm0, %v259_v16  ;;  %651 = vmatmul.msk.f32.vlgmr.msrb.gmra.mxu3 %vm263_vm0, %v259_v16 }
  0xca   : > { %640 = vmatmul.msk.f32.gmra.mxu0 %vm263_vm0, %v260_v19  ;;  %644 = vmatmul.msk.f32.gmra.mxu1 %vm263_vm0, %v260_v19 }
  0xcf   : > { %648 = vmatmul.msk.f32.gmra.mxu2 %vm263_vm0, %v260_v19  ;;  %652 = vmatmul.msk.f32.gmra.mxu3 %vm263_vm0, %v260_v19 }
  0xd2   : > { %641 = vmatmul.msk.f32.gmra.mxu0 %vm263_vm0, %v261_v20  ;;  %645 = vmatmul.msk.f32.gmra.mxu1 %vm263_vm0, %v261_v20 }
  0xd7   : > { %649 = vmatmul.msk.f32.gmra.mxu2 %vm263_vm0, %v261_v20  ;;  %653 = vmatmul.msk.f32.gmra.mxu3 %vm263_vm0, %v261_v20 }
  0xda   : > { %642 = vmatmul.msk.f32.gmra.mxu0 %vm263_vm0, %v262_v21  ;;  %646 = vmatmul.msk.f32.gmra.mxu1 %vm263_vm0, %v262_v21 }
  0xdf   : > { %650 = vmatmul.msk.f32.gmra.mxu2 %vm263_vm0, %v262_v21  ;;  %654 = vmatmul.msk.f32.gmra.mxu3 %vm263_vm0, %v262_v21 }
 0x13f   : > { %v409_v22 = vpop.f32.mrf.mxu0  ;;  %v438_v23 = vpop.f32.mrf.mxu1 }
 0x140   : > { %509 = vst.msk [vmem:[%s928_s17] sm:$0xff] %vm508_vm1, %v409_v22 }
 0x141   : > { %514 = vst.msk [vmem:[%s928_s17 + $0x20] sm:$0xff] %vm508_vm1, %v438_v23 }
 0x147   : > { %v412_v24 = vpop.f32.mrf.mxu0  ;;  %v441_v25 = vpop.f32.mrf.mxu1 }
 0x148   : > { %510 = vst.msk [vmem:[%s928_s17 + $0x8] sm:$0xff] %vm508_vm1, %v412_v24 }
 0x149   : > { %515 = vst.msk [vmem:[%s928_s17 + $0x28] sm:$0xff] %vm508_vm1, %v441_v25 }
 0x14a   : > { %v467_v26 = vpop.f32.mrf.mxu2  ;;  %v496_v27 = vpop.f32.mrf.mxu3 }
 0x14b   : > { %518 = vst.msk [vmem:[%s928_s17 + $0x40] sm:$0xff] %vm508_vm1, %v467_v26 }
 0x14c   : > { %522 = vst.msk [vmem:[%s928_s17 + $0x60] sm:$0xff] %vm508_vm1, %v496_v27 }
 0x14f   : > { %v415_v28 = vpop.f32.mrf.mxu0  ;;  %v444_v29 = vpop.f32.mrf.mxu1 }
 0x150   : > { %511 = vst.msk [vmem:[%s928_s17 + $0x10] sm:$0xff] %vm508_vm1, %v415_v28 }
 0x151   : > { %516 = vst.msk [vmem:[%s928_s17 + $0x30] sm:$0xff] %vm508_vm1, %v444_v29 }
 0x152   : > { %v470_v30 = vpop.f32.mrf.mxu2  ;;  %v499_v31 = vpop.f32.mrf.mxu3 }
 0x153   : > { %519 = vst.msk [vmem:[%s928_s17 + $0x48] sm:$0xff] %vm508_vm1, %v470_v30 }
 0x154   : > { %523 = vst.msk [vmem:[%s928_s17 + $0x68] sm:$0xff] %vm508_vm1, %v499_v31 }
 0x157   : > { %v418_v32 = vpop.f32.mrf.mxu0  ;;  %v447_v33 = vpop.f32.mrf.mxu1 }
 0x158   : > { %513 = vst.msk [vmem:[%s928_s17 + $0x18] sm:$0xf] %vm512_vm2, %v418_v32 }
 0x159   : > { %517 = vst.msk [vmem:[%s928_s17 + $0x38] sm:$0xf] %vm512_vm2, %v447_v33 }
 0x15a   : > { %v473_v34 = vpop.f32.mrf.mxu2  ;;  %v502_v35 = vpop.f32.mrf.mxu3 }
 0x15b   : > { %520 = vst.msk [vmem:[%s928_s17 + $0x50] sm:$0xff] %vm508_vm1, %v473_v34 }
 0x15c   : > { %524 = vst.msk [vmem:[%s928_s17 + $0x70] sm:$0xff] %vm508_vm1, %v502_v35 }
 0x162   : > { %v476_v36 = vpop.f32.mrf.mxu2  ;;  %v505_v37 = vpop.f32.mrf.mxu3 }
 0x163   : > { %521 = vst.msk [vmem:[%s928_s17 + $0x58] sm:$0xf] %vm512_vm2, %v476_v36 }
 0x164   : > { %525 = vst.msk [vmem:[%s928_s17 + $0x78] sm:$0xf] %vm512_vm2, %v505_v37 }
 0x165 PF: > { %p22_p8 = scmp.ge.s32.totalorder %s836_s23, 5   ;;  %s979_s19 = smov %s773_s20 }
 0x166   : > { %s980_s20 = smov %s777_s21  ;;  %s981_s21 = smov %s846_s26 }
 0x167   : > { %s982_s22 = smov %s836_s23  ;;  %24 = sbr.rel (!%p22_p8) target bundleno = 9 (0x9), region = 78 }
 0x16c   :  { %547 = vsyncpa [#allocation5], 1 }
 0x16d   :  { %549 = vsyncpa [#allocation5 + $0x1], 1 }

</bundles_post_ra>
